<compile_context>
chip_gen: v5e
topology: v5e:2x2
jax: 0.10.0
libtpu: 0.0.40
codegen_flags: <defaults>
</compile_context>

<pallas_src>
import numpy as np
import jax
import jax.numpy as jnp
from jax.experimental import pallas as pl
from jax.experimental.pallas import tpu as pltpu

EPS = 1e-5
_VMEM = pl.BlockSpec(memory_space=pltpu.MemorySpace.VMEM)


# ----------------------------- fused Pallas kernel -------------------------

def make_fused_kan_kernel(layer_kinds):
    """Build a single kernel that runs the whole Neural_Kan forward.

    layer_kinds: static tuple of "bn_relu" / "linear" describing the layer
    sequence.  Parameter refs are passed flat, in order:
      bn_relu -> (wt, b, gamma, beta)   with wt:(in_f,out_f), others:(1,out_f)
      linear  -> (wt, b)
    The Python loop below unrolls at trace time; all intermediates stay in
    vregs / VMEM — only the final (B, out_dim) result is stored.
    """
    def kernel(*refs):
        x_ref = refs[0]
        o_ref = refs[-1]
        params = refs[1:-1]

        h = x_ref[...]                                  # (B, in_f) f32
        inv_n = 1.0 / h.shape[0]
        idx = 0
        for kind in layer_kinds:
            if kind == "bn_relu":
                wt, b, g, beta = params[idx:idx + 4]
                idx += 4
                z = jnp.dot(h, wt[...],
                            preferred_element_type=jnp.float32) + b[...]
                # BatchNorm1d (training): one-pass batch mean / biased var.
                mean = jnp.sum(z, axis=0, keepdims=True) * inv_n
                ex2 = jnp.sum(z * z, axis=0, keepdims=True) * inv_n
                var = ex2 - mean * mean
                zhat = (z - mean) * jax.lax.rsqrt(var + EPS)
                h = jnp.maximum(zhat * g[...] + beta[...], 0.0)   # ReLU
            else:                                       # plain fc2 linear
                wt, b = params[idx:idx + 2]
                idx += 2
                h = jnp.dot(h, wt[...],
                            preferred_element_type=jnp.float32) + b[...]
        o_ref[...] = h
    return kernel


def make_neural_kan_forward(layer_kinds, out_dim, num_params):
    kernel = make_fused_kan_kernel(layer_kinds)

    @jax.jit
    def forward(x, *params):
        B = x.shape[0]
        return pl.pallas_call(
            kernel,
            out_shape=jax.ShapeDtypeStruct((B, out_dim), jnp.float32),
            in_specs=[_VMEM] * (1 + num_params),
            out_specs=_VMEM,
        )(x, *params)

    return forward


# ------------------------ parameter construction --------------------------

def hidden_sparsity_mask(out_dim, in_dim, input_neurons, output_neurons):
    """Block-diagonal mask: each input variable has its own private sub-net.
    Mirrors SparseNeuralNetwork.hidden_sparistiy_masks (slices clip OOB)."""
    mask = np.zeros((out_dim, in_dim), dtype=np.float32)
    for i in range(in_dim):
        mask[i * output_neurons:(i + 1) * output_neurons,
             i * input_neurons:(i + 1) * input_neurons] = 1.0
    return jnp.asarray(mask)


def _linear_init(key, out_f, in_f):
    """PyTorch nn.Linear default init: U(-1/sqrt(in_f), 1/sqrt(in_f))."""
    kw, kb = jax.random.split(key)
    bound = 1.0 / np.sqrt(in_f)
    w = jax.random.uniform(kw, (out_f, in_f), jnp.float32, -bound, bound)
    b = jax.random.uniform(kb, (out_f,), jnp.float32, -bound, bound)
    return w, b


def init_neural_kan(key, shape, h):
    """Returns (layer_kinds, flat_params) with kernel-ready layouts:
    weights pre-transposed to (in_f, out_f); bias/gamma/beta as (1, out_f).
    Sparsity masks are multiplied in at init (== multiply_weight_masks)."""
    kinds = []
    flat_params = []
    for i in range(len(shape) - 1):
        in_dim, out_dim = shape[i], shape[i + 1]
        hs = [1] + list(h)
        # hidden masked Linear + BN + ReLU stages
        for layer in range(1, len(hs)):
            key, sub = jax.random.split(key)
            in_f = hs[layer - 1] * in_dim
            out_f = hs[layer] * in_dim
            w, b = _linear_init(sub, out_f, in_f)
            mask = hidden_sparsity_mask(out_f, in_f, hs[layer - 1], hs[layer])
            w = w * mask
            flat_params += [
                jnp.transpose(w),                       # (in_f, out_f)
                b.reshape(1, out_f),
                jnp.ones((1, out_f), jnp.float32),      # BN gamma init
                jnp.zeros((1, out_f), jnp.float32),     # BN beta init
            ]
            kinds.append("bn_relu")
        # fc2
        key, sub = jax.random.split(key)
        w_fc2, b_fc2 = _linear_init(sub, out_dim, hs[-1] * in_dim)
        flat_params += [jnp.transpose(w_fc2), b_fc2.reshape(1, out_dim)]
        kinds.append("linear")
    return tuple(kinds), flat_params


# --------------------------------- main ------------------------------------

if __name__ == "__main__":
    # Neural_Kan(shape=[4, 8, 2], h=[8, 4]):
    #   SparseNN(4 -> 8):  Linear(4->32)+BN+ReLU, Linear(32->16)+BN+ReLU, fc2(16->8)
    #   SparseNN(8 -> 2):  Linear(8->64)+BN+ReLU, Linear(64->32)+BN+ReLU, fc2(32->2)
    shape = [4, 8, 2]
    h = [8, 4]
    batch = 16

    key = jax.random.PRNGKey(0)
    k_params, k_x = jax.random.split(key)
    layer_kinds, flat_params = init_neural_kan(k_params, shape, h)
    x = jax.random.normal(k_x, (batch, shape[0]), jnp.float32)

    forward = make_neural_kan_forward(layer_kinds, shape[-1], len(flat_params))

    out = forward(x, *flat_params)
    out = jax.block_until_ready(out)
    assert out.shape == (batch, shape[-1]), out.shape
    assert out.dtype == jnp.float32
    assert bool(jnp.all(jnp.isfinite(out)))
    print("KERNEL_OK")
</pallas_src>

<mosaic_0001>
module attributes {stable_mosaic.version = 11 : i64} {
  func.func @kernel(%arg0: memref<16x4xf32, #tpu.memory_space<vmem>>, %arg1: memref<4x32xf32, #tpu.memory_space<vmem>>, %arg2: memref<1x32xf32, #tpu.memory_space<vmem>>, %arg3: memref<1x32xf32, #tpu.memory_space<vmem>>, %arg4: memref<1x32xf32, #tpu.memory_space<vmem>>, %arg5: memref<32x16xf32, #tpu.memory_space<vmem>>, %arg6: memref<1x16xf32, #tpu.memory_space<vmem>>, %arg7: memref<1x16xf32, #tpu.memory_space<vmem>>, %arg8: memref<1x16xf32, #tpu.memory_space<vmem>>, %arg9: memref<16x8xf32, #tpu.memory_space<vmem>>, %arg10: memref<1x8xf32, #tpu.memory_space<vmem>>, %arg11: memref<8x64xf32, #tpu.memory_space<vmem>>, %arg12: memref<1x64xf32, #tpu.memory_space<vmem>>, %arg13: memref<1x64xf32, #tpu.memory_space<vmem>>, %arg14: memref<1x64xf32, #tpu.memory_space<vmem>>, %arg15: memref<64x32xf32, #tpu.memory_space<vmem>>, %arg16: memref<1x32xf32, #tpu.memory_space<vmem>>, %arg17: memref<1x32xf32, #tpu.memory_space<vmem>>, %arg18: memref<1x32xf32, #tpu.memory_space<vmem>>, %arg19: memref<32x2xf32, #tpu.memory_space<vmem>>, %arg20: memref<1x2xf32, #tpu.memory_space<vmem>>, %arg21: memref<16x2xf32, #tpu.memory_space<vmem>>) attributes {dimension_semantics = [], scalar_prefetch = 0 : i64, scratch_operands = 0 : i64, tpu.core_type = #tpu.core_type<tc>} {
    %c0 = arith.constant 0 : index
    %c0_0 = arith.constant 0 : index
    %0 = vector.load %arg0[%c0, %c0_0] : memref<16x4xf32, #tpu.memory_space<vmem>>, vector<16x4xf32>
    %c0_1 = arith.constant 0 : index
    %c0_2 = arith.constant 0 : index
    %1 = vector.load %arg1[%c0_1, %c0_2] : memref<4x32xf32, #tpu.memory_space<vmem>>, vector<4x32xf32>
    %cst = arith.constant dense<0.000000e+00> : vector<16x32xf32>
    %2 = tpu.matmul %0, %1, %cst {dimension_numbers = #tpu.dot_dimension_numbers<[1], [0], [0], [1], [0, 0, 1, 1], [], []>} : vector<16x4xf32>, vector<4x32xf32>, vector<16x32xf32> -> vector<16x32xf32>
    %c0_3 = arith.constant 0 : index
    %c0_4 = arith.constant 0 : index
    %3 = vector.load %arg2[%c0_3, %c0_4] : memref<1x32xf32, #tpu.memory_space<vmem>>, vector<1x32xf32>
    %4 = vector.broadcast %3 : vector<1x32xf32> to vector<16x32xf32>
    %5 = arith.addf %2, %4 : vector<16x32xf32>
    %cst_5 = arith.constant dense<0.000000e+00> : vector<32xf32>
    %6 = vector.multi_reduction <add>, %5, %cst_5 [0] : vector<16x32xf32> to vector<32xf32>
    %7 = vector.shape_cast %6 : vector<32xf32> to vector<1x32xf32>
    %cst_6 = arith.constant 6.250000e-02 : f32
    %8 = vector.broadcast %cst_6 : f32 to vector<1x32xf32>
    %9 = arith.mulf %7, %8 : vector<1x32xf32>
    %10 = arith.mulf %5, %5 : vector<16x32xf32>
    %cst_7 = arith.constant dense<0.000000e+00> : vector<32xf32>
    %11 = vector.multi_reduction <add>, %10, %cst_7 [0] : vector<16x32xf32> to vector<32xf32>
    %12 = vector.shape_cast %11 : vector<32xf32> to vector<1x32xf32>
    %cst_8 = arith.constant 6.250000e-02 : f32
    %13 = vector.broadcast %cst_8 : f32 to vector<1x32xf32>
    %14 = arith.mulf %12, %13 : vector<1x32xf32>
    %15 = arith.mulf %9, %9 : vector<1x32xf32>
    %16 = arith.subf %14, %15 : vector<1x32xf32>
    %17 = vector.broadcast %9 : vector<1x32xf32> to vector<16x32xf32>
    %18 = arith.subf %5, %17 : vector<16x32xf32>
    %cst_9 = arith.constant 9.99999974E-6 : f32
    %19 = vector.broadcast %cst_9 : f32 to vector<1x32xf32>
    %20 = arith.addf %16, %19 : vector<1x32xf32>
    %21 = math.rsqrt %20 : vector<1x32xf32>
    %22 = vector.broadcast %21 : vector<1x32xf32> to vector<16x32xf32>
    %23 = arith.mulf %18, %22 : vector<16x32xf32>
    %c0_10 = arith.constant 0 : index
    %c0_11 = arith.constant 0 : index
    %24 = vector.load %arg3[%c0_10, %c0_11] : memref<1x32xf32, #tpu.memory_space<vmem>>, vector<1x32xf32>
    %25 = vector.broadcast %24 : vector<1x32xf32> to vector<16x32xf32>
    %26 = arith.mulf %23, %25 : vector<16x32xf32>
    %c0_12 = arith.constant 0 : index
    %c0_13 = arith.constant 0 : index
    %27 = vector.load %arg4[%c0_12, %c0_13] : memref<1x32xf32, #tpu.memory_space<vmem>>, vector<1x32xf32>
    %28 = vector.broadcast %27 : vector<1x32xf32> to vector<16x32xf32>
    %29 = arith.addf %26, %28 : vector<16x32xf32>
    %cst_14 = arith.constant 0.000000e+00 : f32
    %30 = vector.broadcast %cst_14 : f32 to vector<16x32xf32>
    %31 = arith.maximumf %29, %30 : vector<16x32xf32>
    %c0_15 = arith.constant 0 : index
    %c0_16 = arith.constant 0 : index
    %32 = vector.load %arg5[%c0_15, %c0_16] : memref<32x16xf32, #tpu.memory_space<vmem>>, vector<32x16xf32>
    %cst_17 = arith.constant dense<0.000000e+00> : vector<16x16xf32>
    %33 = tpu.matmul %31, %32, %cst_17 {dimension_numbers = #tpu.dot_dimension_numbers<[1], [0], [0], [1], [0, 0, 1, 1], [], []>} : vector<16x32xf32>, vector<32x16xf32>, vector<16x16xf32> -> vector<16x16xf32>
    %c0_18 = arith.constant 0 : index
    %c0_19 = arith.constant 0 : index
    %34 = vector.load %arg6[%c0_18, %c0_19] : memref<1x16xf32, #tpu.memory_space<vmem>>, vector<1x16xf32>
    %35 = vector.broadcast %34 : vector<1x16xf32> to vector<16x16xf32>
    %36 = arith.addf %33, %35 : vector<16x16xf32>
    %cst_20 = arith.constant dense<0.000000e+00> : vector<16xf32>
    %37 = vector.multi_reduction <add>, %36, %cst_20 [0] : vector<16x16xf32> to vector<16xf32>
    %38 = vector.shape_cast %37 : vector<16xf32> to vector<1x16xf32>
    %cst_21 = arith.constant 6.250000e-02 : f32
    %39 = vector.broadcast %cst_21 : f32 to vector<1x16xf32>
    %40 = arith.mulf %38, %39 : vector<1x16xf32>
    %41 = arith.mulf %36, %36 : vector<16x16xf32>
    %cst_22 = arith.constant dense<0.000000e+00> : vector<16xf32>
    %42 = vector.multi_reduction <add>, %41, %cst_22 [0] : vector<16x16xf32> to vector<16xf32>
    %43 = vector.shape_cast %42 : vector<16xf32> to vector<1x16xf32>
    %cst_23 = arith.constant 6.250000e-02 : f32
    %44 = vector.broadcast %cst_23 : f32 to vector<1x16xf32>
    %45 = arith.mulf %43, %44 : vector<1x16xf32>
    %46 = arith.mulf %40, %40 : vector<1x16xf32>
    %47 = arith.subf %45, %46 : vector<1x16xf32>
    %48 = vector.broadcast %40 : vector<1x16xf32> to vector<16x16xf32>
    %49 = arith.subf %36, %48 : vector<16x16xf32>
    %cst_24 = arith.constant 9.99999974E-6 : f32
    %50 = vector.broadcast %cst_24 : f32 to vector<1x16xf32>
    %51 = arith.addf %47, %50 : vector<1x16xf32>
    %52 = math.rsqrt %51 : vector<1x16xf32>
    %53 = vector.broadcast %52 : vector<1x16xf32> to vector<16x16xf32>
    %54 = arith.mulf %49, %53 : vector<16x16xf32>
    %c0_25 = arith.constant 0 : index
    %c0_26 = arith.constant 0 : index
    %55 = vector.load %arg7[%c0_25, %c0_26] : memref<1x16xf32, #tpu.memory_space<vmem>>, vector<1x16xf32>
    %56 = vector.broadcast %55 : vector<1x16xf32> to vector<16x16xf32>
    %57 = arith.mulf %54, %56 : vector<16x16xf32>
    %c0_27 = arith.constant 0 : index
    %c0_28 = arith.constant 0 : index
    %58 = vector.load %arg8[%c0_27, %c0_28] : memref<1x16xf32, #tpu.memory_space<vmem>>, vector<1x16xf32>
    %59 = vector.broadcast %58 : vector<1x16xf32> to vector<16x16xf32>
    %60 = arith.addf %57, %59 : vector<16x16xf32>
    %cst_29 = arith.constant 0.000000e+00 : f32
    %61 = vector.broadcast %cst_29 : f32 to vector<16x16xf32>
    %62 = arith.maximumf %60, %61 : vector<16x16xf32>
    %c0_30 = arith.constant 0 : index
    %c0_31 = arith.constant 0 : index
    %63 = vector.load %arg9[%c0_30, %c0_31] : memref<16x8xf32, #tpu.memory_space<vmem>>, vector<16x8xf32>
    %cst_32 = arith.constant dense<0.000000e+00> : vector<16x8xf32>
    %64 = tpu.matmul %62, %63, %cst_32 {dimension_numbers = #tpu.dot_dimension_numbers<[1], [0], [0], [1], [0, 0, 1, 1], [], []>} : vector<16x16xf32>, vector<16x8xf32>, vector<16x8xf32> -> vector<16x8xf32>
    %c0_33 = arith.constant 0 : index
    %c0_34 = arith.constant 0 : index
    %65 = vector.load %arg10[%c0_33, %c0_34] : memref<1x8xf32, #tpu.memory_space<vmem>>, vector<1x8xf32>
    %66 = vector.broadcast %65 : vector<1x8xf32> to vector<16x8xf32>
    %67 = arith.addf %64, %66 : vector<16x8xf32>
    %c0_35 = arith.constant 0 : index
    %c0_36 = arith.constant 0 : index
    %68 = vector.load %arg11[%c0_35, %c0_36] : memref<8x64xf32, #tpu.memory_space<vmem>>, vector<8x64xf32>
    %cst_37 = arith.constant dense<0.000000e+00> : vector<16x64xf32>
    %69 = tpu.matmul %67, %68, %cst_37 {dimension_numbers = #tpu.dot_dimension_numbers<[1], [0], [0], [1], [0, 0, 1, 1], [], []>} : vector<16x8xf32>, vector<8x64xf32>, vector<16x64xf32> -> vector<16x64xf32>
    %c0_38 = arith.constant 0 : index
    %c0_39 = arith.constant 0 : index
    %70 = vector.load %arg12[%c0_38, %c0_39] : memref<1x64xf32, #tpu.memory_space<vmem>>, vector<1x64xf32>
    %71 = vector.broadcast %70 : vector<1x64xf32> to vector<16x64xf32>
    %72 = arith.addf %69, %71 : vector<16x64xf32>
    %cst_40 = arith.constant dense<0.000000e+00> : vector<64xf32>
    %73 = vector.multi_reduction <add>, %72, %cst_40 [0] : vector<16x64xf32> to vector<64xf32>
    %74 = vector.shape_cast %73 : vector<64xf32> to vector<1x64xf32>
    %cst_41 = arith.constant 6.250000e-02 : f32
    %75 = vector.broadcast %cst_41 : f32 to vector<1x64xf32>
    %76 = arith.mulf %74, %75 : vector<1x64xf32>
    %77 = arith.mulf %72, %72 : vector<16x64xf32>
    %cst_42 = arith.constant dense<0.000000e+00> : vector<64xf32>
    %78 = vector.multi_reduction <add>, %77, %cst_42 [0] : vector<16x64xf32> to vector<64xf32>
    %79 = vector.shape_cast %78 : vector<64xf32> to vector<1x64xf32>
    %cst_43 = arith.constant 6.250000e-02 : f32
    %80 = vector.broadcast %cst_43 : f32 to vector<1x64xf32>
    %81 = arith.mulf %79, %80 : vector<1x64xf32>
    %82 = arith.mulf %76, %76 : vector<1x64xf32>
    %83 = arith.subf %81, %82 : vector<1x64xf32>
    %84 = vector.broadcast %76 : vector<1x64xf32> to vector<16x64xf32>
    %85 = arith.subf %72, %84 : vector<16x64xf32>
    %cst_44 = arith.constant 9.99999974E-6 : f32
    %86 = vector.broadcast %cst_44 : f32 to vector<1x64xf32>
    %87 = arith.addf %83, %86 : vector<1x64xf32>
    %88 = math.rsqrt %87 : vector<1x64xf32>
    %89 = vector.broadcast %88 : vector<1x64xf32> to vector<16x64xf32>
    %90 = arith.mulf %85, %89 : vector<16x64xf32>
    %c0_45 = arith.constant 0 : index
    %c0_46 = arith.constant 0 : index
    %91 = vector.load %arg13[%c0_45, %c0_46] : memref<1x64xf32, #tpu.memory_space<vmem>>, vector<1x64xf32>
    %92 = vector.broadcast %91 : vector<1x64xf32> to vector<16x64xf32>
    %93 = arith.mulf %90, %92 : vector<16x64xf32>
    %c0_47 = arith.constant 0 : index
    %c0_48 = arith.constant 0 : index
    %94 = vector.load %arg14[%c0_47, %c0_48] : memref<1x64xf32, #tpu.memory_space<vmem>>, vector<1x64xf32>
    %95 = vector.broadcast %94 : vector<1x64xf32> to vector<16x64xf32>
    %96 = arith.addf %93, %95 : vector<16x64xf32>
    %cst_49 = arith.constant 0.000000e+00 : f32
    %97 = vector.broadcast %cst_49 : f32 to vector<16x64xf32>
    %98 = arith.maximumf %96, %97 : vector<16x64xf32>
    %c0_50 = arith.constant 0 : index
    %c0_51 = arith.constant 0 : index
    %99 = vector.load %arg15[%c0_50, %c0_51] : memref<64x32xf32, #tpu.memory_space<vmem>>, vector<64x32xf32>
    %cst_52 = arith.constant dense<0.000000e+00> : vector<16x32xf32>
    %100 = tpu.matmul %98, %99, %cst_52 {dimension_numbers = #tpu.dot_dimension_numbers<[1], [0], [0], [1], [0, 0, 1, 1], [], []>} : vector<16x64xf32>, vector<64x32xf32>, vector<16x32xf32> -> vector<16x32xf32>
    %c0_53 = arith.constant 0 : index
    %c0_54 = arith.constant 0 : index
    %101 = vector.load %arg16[%c0_53, %c0_54] : memref<1x32xf32, #tpu.memory_space<vmem>>, vector<1x32xf32>
    %102 = vector.broadcast %101 : vector<1x32xf32> to vector<16x32xf32>
    %103 = arith.addf %100, %102 : vector<16x32xf32>
    %cst_55 = arith.constant dense<0.000000e+00> : vector<32xf32>
    %104 = vector.multi_reduction <add>, %103, %cst_55 [0] : vector<16x32xf32> to vector<32xf32>
    %105 = vector.shape_cast %104 : vector<32xf32> to vector<1x32xf32>
    %cst_56 = arith.constant 6.250000e-02 : f32
    %106 = vector.broadcast %cst_56 : f32 to vector<1x32xf32>
    %107 = arith.mulf %105, %106 : vector<1x32xf32>
    %108 = arith.mulf %103, %103 : vector<16x32xf32>
    %cst_57 = arith.constant dense<0.000000e+00> : vector<32xf32>
    %109 = vector.multi_reduction <add>, %108, %cst_57 [0] : vector<16x32xf32> to vector<32xf32>
    %110 = vector.shape_cast %109 : vector<32xf32> to vector<1x32xf32>
    %cst_58 = arith.constant 6.250000e-02 : f32
    %111 = vector.broadcast %cst_58 : f32 to vector<1x32xf32>
    %112 = arith.mulf %110, %111 : vector<1x32xf32>
    %113 = arith.mulf %107, %107 : vector<1x32xf32>
    %114 = arith.subf %112, %113 : vector<1x32xf32>
    %115 = vector.broadcast %107 : vector<1x32xf32> to vector<16x32xf32>
    %116 = arith.subf %103, %115 : vector<16x32xf32>
    %cst_59 = arith.constant 9.99999974E-6 : f32
    %117 = vector.broadcast %cst_59 : f32 to vector<1x32xf32>
    %118 = arith.addf %114, %117 : vector<1x32xf32>
    %119 = math.rsqrt %118 : vector<1x32xf32>
    %120 = vector.broadcast %119 : vector<1x32xf32> to vector<16x32xf32>
    %121 = arith.mulf %116, %120 : vector<16x32xf32>
    %c0_60 = arith.constant 0 : index
    %c0_61 = arith.constant 0 : index
    %122 = vector.load %arg17[%c0_60, %c0_61] : memref<1x32xf32, #tpu.memory_space<vmem>>, vector<1x32xf32>
    %123 = vector.broadcast %122 : vector<1x32xf32> to vector<16x32xf32>
    %124 = arith.mulf %121, %123 : vector<16x32xf32>
    %c0_62 = arith.constant 0 : index
    %c0_63 = arith.constant 0 : index
    %125 = vector.load %arg18[%c0_62, %c0_63] : memref<1x32xf32, #tpu.memory_space<vmem>>, vector<1x32xf32>
    %126 = vector.broadcast %125 : vector<1x32xf32> to vector<16x32xf32>
    %127 = arith.addf %124, %126 : vector<16x32xf32>
    %cst_64 = arith.constant 0.000000e+00 : f32
    %128 = vector.broadcast %cst_64 : f32 to vector<16x32xf32>
    %129 = arith.maximumf %127, %128 : vector<16x32xf32>
    %c0_65 = arith.constant 0 : index
    %c0_66 = arith.constant 0 : index
    %130 = vector.load %arg19[%c0_65, %c0_66] : memref<32x2xf32, #tpu.memory_space<vmem>>, vector<32x2xf32>
    %cst_67 = arith.constant dense<0.000000e+00> : vector<16x2xf32>
    %131 = tpu.matmul %129, %130, %cst_67 {dimension_numbers = #tpu.dot_dimension_numbers<[1], [0], [0], [1], [0, 0, 1, 1], [], []>} : vector<16x32xf32>, vector<32x2xf32>, vector<16x2xf32> -> vector<16x2xf32>
    %c0_68 = arith.constant 0 : index
    %c0_69 = arith.constant 0 : index
    %132 = vector.load %arg20[%c0_68, %c0_69] : memref<1x2xf32, #tpu.memory_space<vmem>>, vector<1x2xf32>
    %133 = vector.broadcast %132 : vector<1x2xf32> to vector<16x2xf32>
    %134 = arith.addf %131, %133 : vector<16x2xf32>
    %c0_70 = arith.constant 0 : index
    %c0_71 = arith.constant 0 : index
    %135 = vector.load %arg21[%c0_70, %c0_71] : memref<16x2xf32, #tpu.memory_space<vmem>>, vector<16x2xf32>
    tpu.vector_store %arg21[%c0_70, %c0_71], %134 {strides = array<i32>} : memref<16x2xf32, #tpu.memory_space<vmem>>, vector<16x2xf32>,
    return
  }
}

</mosaic_0001>

<bundles_post_ra>
// kernel: forward.1
= control target key start
LH: loop header
LB: loop body
LE: loop exit
PB: predicated region body
PF: predicated region fallthrough
CT: control target
= control target key end

     0   :  { %vm82_vm0 = vcmask 1043456   ;;  %vm75_vm1 = vcmask 31744   ;;  %vm109_vm2 = vcmask 261120   ;;  %vm200_vm6 = vcmask 130048   ;;  %s820_s1 = inlined_call_operand.vmem [shape: f32[4,32], index: 1, kind: input, shape index: {}]   ;;  %s821_s0 = inlined_call_operand.vmem [shape: f32[16,4], index: 0, kind: input, shape index: {}]   ;;  %s822_s2 = inlined_call_operand.vmem [shape: f32[1,32], index: 2, kind: input, shape index: {}]   ;;  %s823_s3 = inlined_call_operand.vmem [shape: f32[1,32], index: 3, kind: input, shape index: {}]   ;;  %s824_s4 = inlined_call_operand.vmem [shape: f32[1,32], index: 4, kind: input, shape index: {}]   ;;  %s825_s6 = inlined_call_operand.vmem [shape: f32[1,16], index: 6, kind: input, shape index: {}]   ;;  %s826_s5 = inlined_call_operand.vmem [shape: f32[32,16], index: 5, kind: input, shape index: {}]   ;;  %s827_s7 = inlined_call_operand.vmem [shape: f32[1,16], index: 7, kind: input, shape index: {}]   ;;  %s828_s8 = inlined_call_operand.vmem [shape: f32[1,16], index: 8, kind: input, shape index: {}]   ;;  %s829_s10 = inlined_call_operand.vmem [shape: f32[1,8], index: 10, kind: input, shape index: {}]   ;;  %s830_s9 = inlined_call_operand.vmem [shape: f32[16,8], index: 9, kind: input, shape index: {}]   ;;  %s831_s12 = inlined_call_operand.vmem [shape: f32[1,64], index: 12, kind: input, shape index: {}]   ;;  %s832_s11 = inlined_call_operand.vmem [shape: f32[8,64], index: 11, kind: input, shape index: {}]   ;;  %s833_s13 = inlined_call_operand.vmem [shape: f32[1,64], index: 13, kind: input, shape index: {}]   ;;  %s834_s14 = inlined_call_operand.vmem [shape: f32[1,64], index: 14, kind: input, shape index: {}]   ;;  %s835_s16 = inlined_call_operand.vmem [shape: f32[1,32], index: 16, kind: input, shape index: {}]   ;;  %s836_s15 = inlined_call_operand.vmem [shape: f32[64,32], index: 15, kind: input, shape index: {}]   ;;  %s837_s17 = inlined_call_operand.vmem [shape: f32[1,32], index: 17, kind: input, shape index: {}]   ;;  %s838_s18 = inlined_call_operand.vmem [shape: f32[1,32], index: 18, kind: input, shape index: {}]   ;;  %s839_s20 = inlined_call_operand.vmem [shape: f32[1,2], index: 20, kind: input, shape index: {}]   ;;  %s840_s19 = inlined_call_operand.vmem [shape: f32[32,2], index: 19, kind: input, shape index: {}]   ;;  %s841_s21 = inlined_call_operand.vmem [shape: f32[16,2], index: 21, kind: output, shape index: {}]  }
   0x1   :  { %843 = sst [smem:[#allocation2_spill]] %s820_s1  ;;  %v166_v23 = vld [vmem:[%s826_s5 + $0x18] sm:$0xff]  ;;  %v165_v24 = vld [vmem:[%s826_s5 + $0x10] sm:$0xff]  ;;  %v164_v27 = vld [vmem:[%s826_s5 + $0x8] sm:$0xff]  ;;  %vm294_vm10 = vcmask 64512   ;;  %vm324_vm11 = vcmask 523264  }
   0x2   :  { %844 = sst [smem:[#allocation3_spill]] %s821_s0  ;;  %189 = vmatpush.msra.mxu1 %v166_v23  ;;  %v163_v30 = vld [vmem:[%s826_s5] sm:$0xff] }
   0x3   :  { %845 = sst [smem:[#allocation4_spill]] %s822_s2 }
   0x4   :  { %846 = sst [smem:[#allocation5_spill]] %s823_s3  ;;  %190 = vmatpush.msra.mxu1 %v165_v24 }
   0x5   :  { %847 = sst [smem:[#allocation6_spill]] %s824_s4 }
   0x6   :  { %848 = sst [smem:[#allocation7_spill]] %s825_s6  ;;  %191 = vmatpush.msra.mxu1 %v164_v27 }
   0x7   :  { %s849_s26 = sld [smem:[#allocation2_spill]] }
   0x8   :  { %s850_s28 = sld [smem:[#allocation3_spill]]  ;;  %192 = vmatpush.msra.mxu1 %v163_v30 }
   0x9   :  { %s851_s6 = sld [smem:[#allocation4_spill]] }
   0xa   :  { %s853_s4 = sld [smem:[#allocation6_spill]] }
   0xb   :  { %s854_s22 = sld [smem:[#allocation7_spill]] }
   0xd   :  { %v70_v0 = vld [vmem:[%s849_s26] sm:$0xf] }
   0xe   :  { %v68_v1 = vld [vmem:[%s850_s28] sm:$0xff]  ;;  %516 = vmatpush.msk.msra.mxu0 %vm82_vm0, %v70_v0  ;;  %v69_v2 = vld [vmem:[%s850_s28 + $0x8] sm:$0xff]  ;;  %s852_s28 = sld [smem:[#allocation5_spill]] }
   0xf   :  { %517 = vmatmul.msk.f32.vlgmr.msra.gmra.mxu0 %vm75_vm1, %v68_v1  ;;  %v538_v4 = vld [vmem:[%s851_s6] ss:$0 sm:$0xff] }
  0x10   :  { %v540_v48 = vld [vmem:[%s853_s4] ss:$0 sm:$0xff] }
  0x11   :  { %v541_v57 = vld [vmem:[%s854_s22] ss:$0 sm:$0xff] }
  0x14   :  { %v539_v44 = vld [vmem:[%s852_s28] ss:$0 sm:$0xff] }
  0x17   :  { %518 = vmatmul.msk.f32.gmra.mxu0 %vm75_vm1, %v69_v2 }
  0x8c   :  { %v103_v3 = vpop.f32.mrf.mxu0 }
  0x8d   :  { %v104_v5 = vadd.f32 %v538_v4, %v103_v3 }
  0x8f   :  { %v120_v7 = vmul.f32 %v104_v5, %v104_v5  ;;  %v110_v9 = vsel %vm109_vm2, %v104_v5, 0.0 }
  0x91   :  { %v122_v13 = vsel %vm109_vm2, %v120_v7, 0.0 }
  0x94   :  { %v106_v6 = vpop.f32.mrf.mxu0 }
  0x95   :  { %v107_v8 = vadd.f32 %v538_v4, %v106_v6 }
  0x97   :  { %v111_v10 = vsel %vm109_vm2, %v107_v8, 0.0  ;;  %v121_v11 = vmul.f32 %v107_v8, %v107_v8 }
  0x98   :  { %v112_v12 = vadd.f32 %v111_v10, %v110_v9 }
  0x99   :  { %v123_v14 = vsel %vm109_vm2, %v121_v11, 0.0 }
  0x9a   :  { %v113_v15 = vrot.slane %v112_v12, 4  ;;  %v124_v16 = vadd.f32 %v123_v14, %v122_v13  ;;  %v254_v13 = vld [vmem:[%s830_s9] sm:$0xff] }
  0x9c   :  { %v114_v17 = vadd.f32 %v113_v15, %v112_v12  ;;  %v125_v18 = vrot.slane %v124_v16, 4  ;;  %v255_v12 = vld [vmem:[%s830_s9 + $0x8] sm:$0xff] }
  0x9d   :  { %280 = vmatpush.msra.mxu2 %v255_v12  ;;  %v380_v12 = vld [vmem:[%s836_s15 + $0x10] sm:$0xff] }
  0x9e   :  { %v115_v19 = vrot.slane %v114_v17, 2  ;;  %v126_v20 = vadd.f32 %v125_v18, %v124_v16 }
  0x9f   :  { %281 = vmatpush.msra.mxu2 %v254_v13  ;;  %v379_v13 = vld [vmem:[%s836_s15 + $0x8] sm:$0xff] }
  0xa0   :  { %v116_v21 = vadd.f32 %v115_v19, %v114_v17  ;;  %v127_v22 = vrot.slane %v126_v20, 2 }
  0xa2   :  { %v117_v25 = vrot.slane %v116_v21, 1  ;;  %v128_v26 = vadd.f32 %v127_v22, %v126_v20 }
  0xa4   :  { %v118_v28 = vadd.f32 %v117_v25, %v116_v21  ;;  %v129_v29 = vrot.slane %v128_v26, 1 }
  0xa6   :  { %v119_v31 = vmul.f32 0.0625, %v118_v28  ;;  %v130_v32 = vadd.f32 %v129_v29, %v128_v26 }
  0xa8   :  { %v131_v33 = vmul.f32 0.0625, %v130_v32  ;;  %v132_v34 = vmul.f32 %v119_v31, %v119_v31  ;;  %v134_v43 = vsub.f32 %v104_v5, %v119_v31  ;;  %v135_v46 = vsub.f32 %v107_v8, %v119_v31  ;;  %v542_v31 = vld [vmem:[%s827_s7] ss:$0 sm:$0xff] }
  0xaa   :  { %v133_v35 = vsub.f32 %v131_v33, %v132_v34 }
  0xac   :  { %v136_v36 = vadd.f32 1e-05, %v133_v35  ;;  %v543_v35 = vld [vmem:[%s828_s8] ss:$0 sm:$0xff] }
  0xae   :  { %552 = vrsqrt.f32 %v136_v36  ;;  %vm143_vm4 = vweird.f32 %v136_v36 }
  0xb4   :  { %v553_v37 = vpop.eup %552 }
  0xb5   :  { %v138_v38 = vmul.f32 %v553_v37, %v136_v36  ;;  %vm144_vm3 = vweird.f32 %v553_v37 }
  0xb6   :  { %vm145_vm5 = vmor %vm143_vm4, %vm144_vm3  ;;  %vm509_vm3 = vcmask 15360  }
  0xb7   :  { %v139_v39 = vmul.f32 %v553_v37, %v138_v38 }
  0xb9   :  { %v140_v40 = vmul.f32 0.5, %v139_v39 }
  0xbb   :  { %v141_v41 = vsub.f32 1.5, %v140_v40 }
  0xbd   :  { %v142_v42 = vmul.f32 %v553_v37, %v141_v41 }
  0xbf   :  { %v146_v45 = vsel %vm145_vm5, %v553_v37, %v142_v42 }
  0xc0   :  { %v147_v47 = vmul.f32 %v146_v45, %v134_v43  ;;  %v148_v49 = vmul.f32 %v146_v45, %v135_v46  ;;  %v289_v43 = vld [vmem:[%s832_s11] sm:$0xff] }
  0xc1   :  { %316 = vmatpush.msrb.mxu1 %v289_v43  ;;  %529 = vmatpush.msra.mxu3 %v289_v43 }
  0xc2   :  { %v153_v50 = vmul.f32 %v539_v44, %v147_v47  ;;  %v154_v53 = vmul.f32 %v539_v44, %v148_v49  ;;  %v544_v44 = vld [vmem:[%s829_s10] ss:$0 sm:$0xff] }
  0xc3   :  { %v545_v49 = vld [vmem:[%s831_s12] ss:$0 sm:$0xff] }
  0xc4   :  { %v159_v51 = vadd.f32 %v540_v48, %v153_v50  ;;  %v160_v54 = vadd.f32 %v540_v48, %v154_v53 }
  0xc6   :  { %v161_v52 = vmax.f32 %v159_v51, 0.0  ;;  %v162_v55 = vmax.f32 %v160_v54, 0.0 }
  0xc8   :  { %519 = vmatmul.msk.f32.vlgmr.msra.gmra.mxu1 %vm109_vm2, %v161_v52 }
  0xd0   :  { %520 = vmatmul.msk.f32.gmra.mxu1 %vm109_vm2, %v162_v55 }
 0x145   :  { %v194_v56 = vpop.f32.mrf.mxu1 }
 0x146   :  { %v195_v58 = vadd.f32 %v541_v57, %v194_v56 }
 0x148   :  { %v211_v60 = vmul.f32 %v195_v58, %v195_v58  ;;  %v201_v62 = vsel %vm200_vm6, %v195_v58, 0.0 }
 0x14a   :  { %v213_v2 = vsel %vm200_vm6, %v211_v60, 0.0 }
 0x14d   :  { %v197_v59 = vpop.f32.mrf.mxu1 }
 0x14e   :  { %v198_v61 = vadd.f32 %v541_v57, %v197_v59  ;;  %v385_v59 = vld [vmem:[%s836_s15 + $0x38] sm:$0xff] }
 0x14f   :  { %530 = vmatpush.msrb.mxu2 %v385_v59  ;;  %404 = vmatpush.msrb.mxu0 %v385_v59 }
 0x150   :  { %v202_v63 = vsel %vm200_vm6, %v198_v61, 0.0  ;;  %v212_v0 = vmul.f32 %v198_v61, %v198_v61 }
 0x151   :  { %v203_v1 = vadd.f32 %v202_v63, %v201_v62 }
 0x152   :  { %v214_v3 = vsel %vm200_vm6, %v212_v0, 0.0  ;;  %v384_v0 = vld [vmem:[%s836_s15 + $0x30] sm:$0xff] }
 0x153   :  { %v204_v4 = vrot.slane %v203_v1, 4  ;;  %v215_v5 = vadd.f32 %v214_v3, %v213_v2  ;;  %531 = vmatpush.msrb.mxu2 %v384_v0  ;;  %405 = vmatpush.msrb.mxu0 %v384_v0  ;;  %v383_v3 = vld [vmem:[%s836_s15 + $0x28] sm:$0xff] }
 0x155   :  { %v205_v6 = vadd.f32 %v204_v4, %v203_v1  ;;  %v216_v7 = vrot.slane %v215_v5, 4  ;;  %532 = vmatpush.msrb.mxu2 %v383_v3  ;;  %406 = vmatpush.msrb.mxu0 %v383_v3 }
 0x157   :  { %v206_v8 = vrot.slane %v205_v6, 2  ;;  %v217_v9 = vadd.f32 %v216_v7, %v215_v5 }
 0x159   :  { %v207_v10 = vadd.f32 %v206_v8, %v205_v6  ;;  %v218_v11 = vrot.slane %v217_v9, 2  ;;  %v382_v6 = vld [vmem:[%s836_s15 + $0x20] sm:$0xff] }
 0x15a   :  { %533 = vmatpush.msrb.mxu2 %v382_v6  ;;  %407 = vmatpush.msrb.mxu0 %v382_v6 }
 0x15b   :  { %v208_v14 = vrot.slane %v207_v10, 1  ;;  %v219_v15 = vadd.f32 %v218_v11, %v217_v9  ;;  %v381_v9 = vld [vmem:[%s836_s15 + $0x18] sm:$0xff] }
 0x15c   :  { %534 = vmatpush.msrb.mxu2 %v381_v9  ;;  %408 = vmatpush.msrb.mxu0 %v381_v9 }
 0x15d   :  { %v209_v16 = vadd.f32 %v208_v14, %v207_v10  ;;  %v220_v17 = vrot.slane %v219_v15, 1 }
 0x15e   :  { %535 = vmatpush.msrb.mxu2 %v380_v12  ;;  %409 = vmatpush.msrb.mxu0 %v380_v12 }
 0x15f   :  { %v210_v18 = vmul.f32 0.0625, %v209_v16  ;;  %v221_v19 = vadd.f32 %v220_v17, %v219_v15  ;;  %v378_v16 = vld [vmem:[%s836_s15] sm:$0xff] }
 0x160   :  { %536 = vmatpush.msrb.mxu2 %v379_v13  ;;  %410 = vmatpush.msrb.mxu0 %v379_v13 }
 0x161   :  { %v222_v20 = vmul.f32 0.0625, %v221_v19  ;;  %v223_v21 = vmul.f32 %v210_v18, %v210_v18  ;;  %v225_v30 = vsub.f32 %v195_v58, %v210_v18  ;;  %v226_v33 = vsub.f32 %v198_v61, %v210_v18 }
 0x162   :  { %537 = vmatpush.msrb.mxu2 %v378_v16  ;;  %411 = vmatpush.msrb.mxu0 %v378_v16 }
 0x163   :  { %v224_v22 = vsub.f32 %v222_v20, %v223_v21 }
 0x165   :  { %v227_v23 = vadd.f32 1e-05, %v224_v22 }
 0x167   :  { %554 = vrsqrt.f32 %v227_v23  ;;  %vm234_vm8 = vweird.f32 %v227_v23 }
 0x16d   :  { %v555_v24 = vpop.eup %554 }
 0x16e   :  { %v229_v25 = vmul.f32 %v555_v24, %v227_v23  ;;  %vm235_vm7 = vweird.f32 %v555_v24 }
 0x16f   :  { %vm236_vm9 = vmor %vm234_vm8, %vm235_vm7 }
 0x170   :  { %v230_v26 = vmul.f32 %v555_v24, %v229_v25 }
 0x172   :  { %v231_v27 = vmul.f32 0.5, %v230_v26 }
 0x174   :  { %v232_v28 = vsub.f32 1.5, %v231_v27 }
 0x176   :  { %v233_v29 = vmul.f32 %v555_v24, %v232_v28 }
 0x178   :  { %v237_v32 = vsel %vm236_vm9, %v555_v24, %v233_v29 }
 0x179   :  { %v238_v34 = vmul.f32 %v237_v32, %v225_v30  ;;  %v239_v36 = vmul.f32 %v237_v32, %v226_v33 }
 0x17b   :  { %v244_v37 = vmul.f32 %v542_v31, %v238_v34  ;;  %v245_v40 = vmul.f32 %v542_v31, %v239_v36  ;;  %v546_v31 = vld [vmem:[%s833_s13] ss:$0 sm:$0xff] }
 0x17d   :  { %v250_v38 = vadd.f32 %v543_v35, %v244_v37  ;;  %v251_v41 = vadd.f32 %v543_v35, %v245_v40  ;;  %v547_v35 = vld [vmem:[%s834_s14] ss:$0 sm:$0xff] }
 0x17f   :  { %v252_v39 = vmax.f32 %v250_v38, 0.0  ;;  %v253_v42 = vmax.f32 %v251_v41, 0.0 }
 0x181   :  { %521 = vmatmul.msk.f32.vlgmr.msra.gmra.mxu2 %vm200_vm6, %v252_v39 }
 0x189   :  { %522 = vmatmul.msk.f32.gmra.mxu2 %vm200_vm6, %v253_v42  ;;  %v548_v42 = vld [vmem:[%s835_s16] ss:$0 sm:$0xff] }
 0x204   :  { %v283_v45 = vpop.f32.mrf.mxu2 }
 0x205   :  { %v284_v46 = vadd.f32 %v544_v44, %v283_v45 }
 0x207   :  { %523 = vmatmul.msk.f32.vlgmr.msrb.gmra.mxu1 %vm294_vm10, %v284_v46 }
 0x20c   :  { %v286_v47 = vpop.f32.mrf.mxu2 }
 0x20d   :  { %v287_v48 = vadd.f32 %v544_v44, %v286_v47 }
 0x20f   :  { %524 = vmatmul.msk.f32.vlgmr.msra.gmra.mxu3 %vm294_vm10, %v287_v48 }
 0x284   :  { %v318_v50 = vpop.f32.mrf.mxu1 }
 0x285   :  { %v736_v51 = vadd.f32 %v545_v49, %v318_v50 }
 0x287   :  { %v335_v53 = vmul.f32 %v736_v51, %v736_v51  ;;  %v325_v55 = vsel %vm324_vm11, %v736_v51, 0.0 }
 0x289   :  { %v337_v60 = vsel %vm324_vm11, %v335_v53, 0.0 }
 0x292   :  { %v321_v52 = vpop.f32.mrf.mxu3 }
 0x293   :  { %v740_v54 = vadd.f32 %v545_v49, %v321_v52 }
 0x295   :  { %v326_v56 = vsel %vm324_vm11, %v740_v54, 0.0  ;;  %v336_v57 = vmul.f32 %v740_v54, %v740_v54 }
 0x296   :  { %v327_v58 = vadd.f32 %v326_v56, %v325_v55 }
 0x297   :  { %v338_v61 = vsel %vm324_vm11, %v336_v57, 0.0 }
 0x298   :  { %v328_v62 = vrot.slane %v327_v58, 4  ;;  %v339_v63 = vadd.f32 %v338_v61, %v337_v60 }
 0x29a   :  { %v329_v1 = vadd.f32 %v328_v62, %v327_v58  ;;  %v340_v2 = vrot.slane %v339_v63, 4  ;;  %v475_v62 = vld [vmem:[%s840_s19 + $0x18] sm:$0xff] }
 0x29b   :  { %498 = vmatpush.msrb.mxu3 %v475_v62 }
 0x29c   :  { %v330_v4 = vrot.slane %v329_v1, 2  ;;  %v341_v5 = vadd.f32 %v340_v2, %v339_v63  ;;  %v474_v63 = vld [vmem:[%s840_s19 + $0x10] sm:$0xff]  ;;  %v473_v2 = vld [vmem:[%s840_s19 + $0x8] sm:$0xff] }
 0x29d   :  { %499 = vmatpush.msrb.mxu3 %v474_v63 }
 0x29e   :  { %v331_v7 = vadd.f32 %v330_v4, %v329_v1  ;;  %v342_v8 = vrot.slane %v341_v5, 2 }
 0x29f   :  { %500 = vmatpush.msrb.mxu3 %v473_v2 }
 0x2a0   :  { %v332_v10 = vrot.slane %v331_v7, 1  ;;  %v343_v11 = vadd.f32 %v342_v8, %v341_v5  ;;  %v472_v5 = vld [vmem:[%s840_s19] sm:$0xff] }
 0x2a1   :  { %501 = vmatpush.msrb.mxu3 %v472_v5 }
 0x2a2   :  { %v333_v14 = vadd.f32 %v332_v10, %v331_v7  ;;  %v344_v15 = vrot.slane %v343_v11, 1 }
 0x2a4   :  { %v334_v17 = vmul.f32 0.0625, %v333_v14  ;;  %v345_v18 = vadd.f32 %v344_v15, %v343_v11 }
 0x2a6   :  { %v346_v19 = vmul.f32 0.0625, %v345_v18  ;;  %v347_v20 = vmul.f32 %v334_v17, %v334_v17  ;;  %v349_v29 = vsub.f32 %v736_v51, %v334_v17  ;;  %v350_v30 = vsub.f32 %v740_v54, %v334_v17 }
 0x2a8   :  { %v348_v21 = vsub.f32 %v346_v19, %v347_v20  ;;  %v549_v19 = vld [vmem:[%s837_s17] ss:$0 sm:$0xff] }
 0x2aa   :  { %v351_v22 = vadd.f32 1e-05, %v348_v21 }
 0x2ac   :  { %556 = vrsqrt.f32 %v351_v22  ;;  %vm358_vm13 = vweird.f32 %v351_v22 }
 0x2b2   :  { %v557_v23 = vpop.eup %556 }
 0x2b3   :  { %v353_v24 = vmul.f32 %v557_v23, %v351_v22  ;;  %vm359_vm12 = vweird.f32 %v557_v23 }
 0x2b4   :  { %vm360_vm14 = vmor %vm358_vm13, %vm359_vm12 }
 0x2b5   :  { %v354_v25 = vmul.f32 %v557_v23, %v353_v24 }
 0x2b7   :  { %v355_v26 = vmul.f32 0.5, %v354_v25 }
 0x2b9   :  { %v356_v27 = vsub.f32 1.5, %v355_v26 }
 0x2bb   :  { %v357_v28 = vmul.f32 %v557_v23, %v356_v27 }
 0x2bd   :  { %v361_v32 = vsel %vm360_vm14, %v557_v23, %v357_v28  ;;  %v550_v23 = vld [vmem:[%s838_s18] ss:$0 sm:$0xff] }
 0x2be   :  { %v362_v33 = vmul.f32 %v361_v32, %v349_v29  ;;  %v363_v34 = vmul.f32 %v361_v32, %v350_v30 }
 0x2c0   :  { %v369_v36 = vmul.f32 %v546_v31, %v363_v34  ;;  %v368_v37 = vmul.f32 %v546_v31, %v362_v33  ;;  %v551_v31 = vld [vmem:[%s839_s20] ss:$0 sm:$0xff] }
 0x2c2   :  { %v374_v38 = vadd.f32 %v547_v35, %v368_v37  ;;  %v375_v39 = vadd.f32 %v547_v35, %v369_v36 }
 0x2c4   :  { %v376_v40 = vmax.f32 %v374_v38, 0.0  ;;  %v377_v41 = vmax.f32 %v375_v39, 0.0 }
 0x2c6   :  { %525 = vmatmul.msk.f32.vlgmr.msrb.gmra.mxu0 %vm324_vm11, %v376_v40  ;;  %526 = vmatmul.msk.f32.vlgmr.msrb.gmra.mxu2 %vm324_vm11, %v377_v41 }
 0x343   :  { %v413_v43 = vpop.f32.mrf.mxu0 }
 0x344   :  { %v414_v44 = vadd.f32 %v548_v42, %v413_v43 }
 0x346   :  { %v429_v46 = vmul.f32 %v414_v44, %v414_v44  ;;  %v419_v48 = vsel %vm109_vm2, %v414_v44, 0.0 }
 0x348   :  { %v431_v52 = vsel %vm109_vm2, %v429_v46, 0.0 }
 0x349   :  { %v416_v45 = vpop.f32.mrf.mxu2 }
 0x34a   :  { %v417_v47 = vadd.f32 %v548_v42, %v416_v45 }
 0x34c   :  { %v420_v49 = vsel %vm109_vm2, %v417_v47, 0.0  ;;  %v430_v50 = vmul.f32 %v417_v47, %v417_v47 }
 0x34d   :  { %v421_v51 = vadd.f32 %v420_v49, %v419_v48 }
 0x34e   :  { %v432_v53 = vsel %vm109_vm2, %v430_v50, 0.0 }
 0x34f   :  { %v422_v54 = vrot.slane %v421_v51, 4  ;;  %v433_v55 = vadd.f32 %v432_v53, %v431_v52 }
 0x351   :  { %v423_v56 = vadd.f32 %v422_v54, %v421_v51  ;;  %v434_v57 = vrot.slane %v433_v55, 4 }
 0x353   :  { %v424_v58 = vrot.slane %v423_v56, 2  ;;  %v435_v59 = vadd.f32 %v434_v57, %v433_v55 }
 0x355   :  { %v425_v60 = vadd.f32 %v424_v58, %v423_v56  ;;  %v436_v61 = vrot.slane %v435_v59, 2 }
 0x357   :  { %v426_v0 = vrot.slane %v425_v60, 1  ;;  %v437_v1 = vadd.f32 %v436_v61, %v435_v59 }
 0x359   :  { %v427_v3 = vadd.f32 %v426_v0, %v425_v60  ;;  %v438_v4 = vrot.slane %v437_v1, 1 }
 0x35b   :  { %v428_v6 = vmul.f32 0.0625, %v427_v3  ;;  %v439_v7 = vadd.f32 %v438_v4, %v437_v1 }
 0x35d   :  { %v440_v8 = vmul.f32 0.0625, %v439_v7  ;;  %v441_v9 = vmul.f32 %v428_v6, %v428_v6  ;;  %v443_v18 = vsub.f32 %v414_v44, %v428_v6  ;;  %v444_v21 = vsub.f32 %v417_v47, %v428_v6 }
 0x35f   :  { %v442_v10 = vsub.f32 %v440_v8, %v441_v9 }
 0x361   :  { %v445_v11 = vadd.f32 1e-05, %v442_v10 }
 0x363   :  { %558 = vrsqrt.f32 %v445_v11  ;;  %vm452_vm0 = vweird.f32 %v445_v11 }
 0x369   :  { %v559_v12 = vpop.eup %558 }
 0x36a   :  { %v447_v13 = vmul.f32 %v559_v12, %v445_v11  ;;  %vm453_vm15 = vweird.f32 %v559_v12 }
 0x36b   :  { %vm454_vm1 = vmor %vm452_vm0, %vm453_vm15 }
 0x36c   :  { %v448_v14 = vmul.f32 %v559_v12, %v447_v13 }
 0x36e   :  { %v449_v15 = vmul.f32 0.5, %v448_v14 }
 0x370   :  { %v450_v16 = vsub.f32 1.5, %v449_v15 }
 0x372   :  { %v451_v17 = vmul.f32 %v559_v12, %v450_v16 }
 0x374   :  { %v455_v20 = vsel %vm454_vm1, %v559_v12, %v451_v17 }
 0x375   :  { %v456_v22 = vmul.f32 %v455_v20, %v443_v18  ;;  %v457_v24 = vmul.f32 %v455_v20, %v444_v21 }
 0x377   :  { %v462_v25 = vmul.f32 %v549_v19, %v456_v22  ;;  %v463_v28 = vmul.f32 %v549_v19, %v457_v24 }
 0x379   :  { %v468_v26 = vadd.f32 %v550_v23, %v462_v25  ;;  %v469_v29 = vadd.f32 %v550_v23, %v463_v28 }
 0x37b   :  { %v470_v27 = vmax.f32 %v468_v26, 0.0  ;;  %v471_v30 = vmax.f32 %v469_v29, 0.0 }
 0x37d   :  { %527 = vmatmul.msk.f32.vlgmr.msrb.gmra.mxu3 %vm109_vm2, %v470_v27 }
 0x385   :  { %528 = vmatmul.msk.f32.gmra.mxu3 %vm109_vm2, %v471_v30 }
 0x400   :  { %v503_v32 = vpop.f32.mrf.mxu3 }
 0x401   :  { %v504_v33 = vadd.f32 %v551_v31, %v503_v32 }
 0x403   :  { %510 = vst.msk [vmem:[%s841_s21] sm:$0xff] %vm509_vm3, %v504_v33 }
 0x408   :  { %v506_v34 = vpop.f32.mrf.mxu3 }
 0x409   :  { %v507_v35 = vadd.f32 %v551_v31, %v506_v34 }
 0x40b   :  { %511 = vst.msk [vmem:[%s841_s21 + $0x8] sm:$0xff] %vm509_vm3, %v507_v35 }

</bundles_post_ra>
